<compile_context>
chip_gen: v7x
topology: tpu7x:2x2x1
jax: 0.10.0
libtpu: 0.0.40
codegen_flags: <defaults>
</compile_context>

<pallas_src>
import numpy as np
import jax
import jax.numpy as jnp
from jax.experimental import pallas as pl
from jax.experimental.pallas import tpu as pltpu


def _eqconvt_matmul_kernel(x_ref, w_ref, b_ref, o_ref):
    # x_ref: (c_in, tp) f32/bf16 | w_ref: (ndim, c_in) bf16 (scale pre-folded)
    # b_ref: (ndim, 1) f32 (scale_bias pre-folded)  | o_ref: (ndim, tp) bf16
    xb = x_ref[...].astype(jnp.bfloat16)   # VPU cast; free filler in a mem-bound kernel
    acc = jnp.dot(w_ref[...], xb, preferred_element_type=jnp.float32)   # MXU, f32 acc
    o_ref[...] = (acc + b_ref[...]).astype(o_ref.dtype)                 # bf16 store


def equalized_transposed_conv2d(x, weight, bias, *, stride=(2, 2), padding=(0, 0),
                                tp=1024, out_dtype=jnp.float32):
    n, c_in, h, w_sp = x.shape
    c_in_w, c_out, kh, kw = weight.shape
    assert c_in == c_in_w
    sh, sw = stride
    ph, pw = padding
    assert (kh, kw) == (sh, sw) and (ph, pw) == (0, 0), (
        "only kernel_size == stride, padding == 0 (module defaults) supported")
    # TODO(synk): general stride/padding (overlapping-tap) transposed conv not implemented.

    scale = float(np.sqrt(2.0) / np.sqrt(c_in * kh * kw))
    scale_bias = float(np.sqrt(2.0) / np.sqrt(c_out))

    p = h * w_sp                 # pixels per image  -> lane axis
    ndim = c_out * kh * kw       # (co, kh, kw)      -> sublane axis

    # Input: NCHW -> (n, c_in, P) is a contiguous (free) reshape.  No astype
    # here: a standalone bf16 cast would be an extra full HBM pass; the cast
    # happens in-kernel instead (or is a no-op if the caller already gives bf16).
    x3 = x.reshape(n, c_in, p)
    x_bytes = x3.dtype.itemsize

    # Weight: (c_in, c_out, kh, kw) -> (ndim, c_in).  Fold `scale` in f32
    # BEFORE the bf16 cast (one-time tiny constant, free in the wrapper).
    w2t = (weight.astype(jnp.float32) * scale).reshape(c_in, ndim).T.astype(jnp.bfloat16)
    if bias is None:
        b2 = jnp.zeros((ndim, 1), jnp.float32)
    else:
        b2 = jnp.broadcast_to((bias.astype(jnp.float32) * scale_bias)[:, None],
                              (c_out, kh * kw)).reshape(ndim, 1)

    # Pixel tile: large (multiple of 256 -- v6e/v7x MXU is 256x256) when
    # possible, else full extent.  Ragged last tile handled by masked stores.
    if tp >= p:
        tp = p
    else:
        tp = max(256, (tp // 256) * 256)
    # v7x shards "parallel" grid axes over 2 TensorCores: guarantee >=2 units.
    if n * (-(-p // tp)) < 2 and p >= 512:
        tp = max(256, ((p // 2) // 256) * 256)
    grid = (n, pl.cdiv(p, tp))

    # VMEM budget: double-buffered X/Y tiles + resident weight/bias.  Cap at
    # 48 MiB so we never request all of v7x's 64 MiB physical VMEM.
    vmem_need = (2 * (c_in * tp * x_bytes + ndim * tp * 2)
                 + ndim * c_in * 2 + ndim * 4 + (2 << 20))
    vmem_limit = int(min(max(vmem_need, 32 << 20), 48 << 20))

    cost = pl.CostEstimate(
        flops=2 * n * p * c_in * ndim,
        transcendentals=0,
        bytes_accessed=x3.size * x_bytes + w2t.size * 2 + b2.size * 4 + n * ndim * p * 2)

    y3 = pl.pallas_call(
        _eqconvt_matmul_kernel,
        out_shape=jax.ShapeDtypeStruct((n, ndim, p), jnp.bfloat16),
        grid_spec=pltpu.PrefetchScalarGridSpec(
            num_scalar_prefetch=0,
            grid=grid,
            in_specs=[
                pl.BlockSpec((None, c_in, tp), lambda b, j: (b, 0, j)),   # activations
                pl.BlockSpec((ndim, c_in), lambda b, j: (0, 0)),          # weight, resident
                pl.BlockSpec((ndim, 1), lambda b, j: (0, 0)),             # bias, resident
            ],
            out_specs=pl.BlockSpec((None, ndim, tp), lambda b, j: (b, 0, j)),
        ),
        compiler_params=pltpu.CompilerParams(
            dimension_semantics=("parallel", "parallel"),
            vmem_limit_bytes=vmem_limit),
        cost_estimate=cost,
    )(x3, w2t, b2)

    # Pixel-shuffle scatter back to NCHW (single XLA pass; reads bf16 now, so
    # this pass is ~2x cheaper than the previous f32 intermediate):
    #   y3[b, (co,kh,kw), (h,w)] -> out[b, co, h*sh+kh, w*sw+kw]
    # TODO(synk): fully fuse the shuffle into the kernel store path (kw pair
    # packed into u32 lanes + kh via strided sublane stores) to drop this pass.
    y6 = y3.reshape(n, c_out, kh, kw, h, w_sp)
    out = y6.transpose(0, 1, 4, 2, 5, 3).reshape(n, c_out, h * sh, w_sp * sw)
    return out.astype(out_dtype)


def _reference(x, weight, bias, sh, sw, quantize_bf16):
    """Pure-JAX reference for conv_transpose2d with kernel==stride, pad=0."""
    c_in, c_out, kh, kw = weight.shape
    n, _, h, w_sp = x.shape
    scale = np.sqrt(2.0) / np.sqrt(c_in * kh * kw)
    scale_bias = np.sqrt(2.0) / np.sqrt(c_out)
    wf = weight.astype(jnp.float32) * scale
    xf = x.astype(jnp.float32)
    if quantize_bf16:   # mirror the kernel's bf16 operand rounding
        wf = wf.astype(jnp.bfloat16).astype(jnp.float32)
        xf = xf.astype(jnp.bfloat16).astype(jnp.float32)
    y = jnp.einsum("nihw,iokl->nohkwl", xf, wf)
    y = y.reshape(n, c_out, h * kh, w_sp * kw)
    if bias is not None:
        y = y + (bias.astype(jnp.float32) * scale_bias)[None, :, None, None]
    return y


if __name__ == "__main__":
    key = jax.random.PRNGKey(0)
    kx, kw_, kx2, kw2 = jax.random.split(key, 4)

    # --- Test 1: module defaults (kernel_size=2, stride=2, padding=0, bias) ---
    N, C_IN, C_OUT, H, W = 2, 4, 8, 16, 16
    KH = KW = SH = SW = 2
    x = jax.random.normal(kx, (N, C_IN, H, W), dtype=jnp.float32)              # NCHW
    weight = jax.random.normal(kw_, (C_IN, C_OUT, KH, KW), dtype=jnp.float32)  # (in, out, kh, kw)
    bias = jnp.ones((C_OUT,), dtype=jnp.float32)                               # torch.ones init

    out = equalized_transposed_conv2d(x, weight, bias, stride=(SH, SW), padding=(0, 0))
    out = jax.block_until_ready(out)
    assert out.shape == (N, C_OUT, H * SH, W * SW)
    assert out.dtype == jnp.float32

    # Tight-ish check vs. a reference using the same bf16-rounded operands
    # (allows for the bf16 output-store rounding of the kernel intermediate).
    ref_b = _reference(x, weight, bias, SH, SW, quantize_bf16=True)
    assert jnp.allclose(out, ref_b, atol=2e-2, rtol=2e-2)
    # Loose check vs. exact f32 module semantics (bf16 quantization only).
    ref_f = _reference(x, weight, bias, SH, SW, quantize_bf16=False)
    assert jnp.allclose(out, ref_f, atol=1e-1, rtol=1e-1)

    # --- Test 2: ragged pixel tile (p not a multiple of tp), no bias ---------
    N2, C_IN2, C_OUT2, H2, W2 = 1, 3, 8, 20, 16     # p = 320, tp = 256 -> ragged tail
    x2 = jax.random.normal(kx2, (N2, C_IN2, H2, W2), dtype=jnp.float32)
    weight2 = jax.random.normal(kw2, (C_IN2, C_OUT2, KH, KW), dtype=jnp.float32)

    out2 = equalized_transposed_conv2d(x2, weight2, None, stride=(SH, SW), padding=(0, 0),
                                       tp=256)
    out2 = jax.block_until_ready(out2)
    assert out2.shape == (N2, C_OUT2, H2 * SH, W2 * SW)
    ref2 = _reference(x2, weight2, None, SH, SW, quantize_bf16=True)
    assert jnp.allclose(out2, ref2, atol=2e-2, rtol=2e-2)

    print("KERNEL_OK")
</pallas_src>

<mosaic_0001>
module attributes {stable_mosaic.version = 11 : i64} {
  func.func @_eqconvt_matmul_kernel(%arg0: i32, %arg1: i32, %arg2: memref<1x4x256xf32, #tpu.memory_space<vmem>>, %arg3: memref<32x4xbf16, #tpu.memory_space<vmem>>, %arg4: memref<32x1xf32, #tpu.memory_space<vmem>>, %arg5: memref<1x32x256xbf16, #tpu.memory_space<vmem>>) attributes {dimension_semantics = [#tpu.dimension_semantics<parallel>, #tpu.dimension_semantics<parallel>], iteration_bounds = array<i64: 2, 1>, scalar_prefetch = 0 : i64, scratch_operands = 0 : i64, tpu.core_type = #tpu.core_type<tc>, window_params = [{transform_indices = @transform_0, window_bounds = array<i64: 1, 4, 256>}, {pipeline_mode = #tpu.pipeline_mode<synchronous>, transform_indices = @transform_1, window_bounds = array<i64: 32, 4>}, {pipeline_mode = #tpu.pipeline_mode<synchronous>, transform_indices = @transform_2, window_bounds = array<i64: 32, 1>}, {transform_indices = @transform_3, window_bounds = array<i64: 1, 32, 256>}]} {
    %c0 = arith.constant 0 : index
    %c0_0 = arith.constant 0 : index
    %c0_1 = arith.constant 0 : index
    %0 = vector.load %arg2[%c0, %c0_0, %c0_1] : memref<1x4x256xf32, #tpu.memory_space<vmem>>, vector<1x4x256xf32>
    %1 = vector.shape_cast %0 : vector<1x4x256xf32> to vector<4x256xf32>
    %2 = arith.truncf %1 : vector<4x256xf32> to vector<4x256xbf16>
    %c0_2 = arith.constant 0 : index
    %c0_3 = arith.constant 0 : index
    %3 = vector.load %arg3[%c0_2, %c0_3] : memref<32x4xbf16, #tpu.memory_space<vmem>>, vector<32x4xbf16>
    %cst = arith.constant dense<0.000000e+00> : vector<32x256xf32>
    %4 = tpu.matmul %3, %2, %cst {dimension_numbers = #tpu.dot_dimension_numbers<[1], [0], [0], [1], [0, 0, 1, 1], [], []>} : vector<32x4xbf16>, vector<4x256xbf16>, vector<32x256xf32> -> vector<32x256xf32>
    %c0_4 = arith.constant 0 : index
    %c0_5 = arith.constant 0 : index
    %5 = vector.load %arg4[%c0_4, %c0_5] : memref<32x1xf32, #tpu.memory_space<vmem>>, vector<32x1xf32>
    %6 = vector.broadcast %5 : vector<32x1xf32> to vector<32x256xf32>
    %7 = arith.addf %4, %6 : vector<32x256xf32>
    %8 = arith.truncf %7 : vector<32x256xf32> to vector<32x256xbf16>
    %c0_6 = arith.constant 0 : index
    %c0_7 = arith.constant 0 : index
    %c0_8 = arith.constant 0 : index
    %9 = vector.load %arg5[%c0_6, %c0_7, %c0_8] : memref<1x32x256xbf16, #tpu.memory_space<vmem>>, vector<1x32x256xbf16>
    %10 = vector.shape_cast %9 : vector<1x32x256xbf16> to vector<32x256xbf16>
    %11 = vector.shape_cast %8 : vector<32x256xbf16> to vector<1x32x256xbf16>
    tpu.vector_store %arg5[%c0_6, %c0_7, %c0_8], %11 {strides = array<i32>} : memref<1x32x256xbf16, #tpu.memory_space<vmem>>, vector<1x32x256xbf16>,
    return
  }
  func.func @transform_0(%arg0: i32, %arg1: i32) -> (i32, i32, i32) {
    %c0_i32 = arith.constant 0 : i32
    %c0_i32_0 = arith.constant 0 : i32
    return %arg0, %c0_i32, %arg1 : i32, i32, i32
  }
  func.func @transform_1(%arg0: i32, %arg1: i32) -> (i32, i32) {
    %c0_i32 = arith.constant 0 : i32
    %c0_i32_0 = arith.constant 0 : i32
    %c0_i32_1 = arith.constant 0 : i32
    return %c0_i32, %c0_i32_0 : i32, i32
  }
  func.func @transform_2(%arg0: i32, %arg1: i32) -> (i32, i32) {
    %c0_i32 = arith.constant 0 : i32
    %c0_i32_0 = arith.constant 0 : i32
    %c0_i32_1 = arith.constant 0 : i32
    return %c0_i32, %c0_i32_0 : i32, i32
  }
  func.func @transform_3(%arg0: i32, %arg1: i32) -> (i32, i32, i32) {
    %c0_i32 = arith.constant 0 : i32
    %c0_i32_0 = arith.constant 0 : i32
    return %arg0, %c0_i32, %arg1 : i32, i32, i32
  }
}

</mosaic_0001>

<bundles_post_ra>
// kernel: tpu_custom_call.1
= control target key start
LH: loop header
LB: loop body
LE: loop exit
PB: predicated region body
PF: predicated region fallthrough
CT: control target
= control target key end

     0   :  { %8 = vsyncpa [#allocation3], 0  ;;  %s769_s0 = inlined_call_operand.vmem [shape: f32[2,4,256], index: 0, kind: input, shape index: {}]   ;;  %s770_s1 = inlined_call_operand.vmem [shape: bf16[32,4], index: 1, kind: input, shape index: {}]   ;;  %s771_s2 = inlined_call_operand.vmem [shape: f32[32,1], index: 2, kind: input, shape index: {}]   ;;  %s772_s3 = inlined_call_operand.hbm [shape: bf16[2,32,256], index: 3, kind: output, shape index: {}]  }
   0x1   :  { %10 = vsyncpa [#allocation3 + $0x1], 0  ;;  %s632_s12 = smov 0   ;;  %s634_s13 = smov 0  }
   0x2   :  { %s636_s14 = smov 0   ;;  %s638_s15 = smov 0  }
   0x3   :  { %s640_s16 = smov 0   ;;  %s642_s17 = smov 0  }
   0x4 LB: > { %s435_s18 = sadd.s32 4294967295, %s606_s17   ;;  %s436_s19 = sadd.s32 4294967294, %s606_s17   ;;  %s606_s17 = sphi %s642_s17, %s16_s17   ;;  %s602_s16 = sphi %s640_s16, %s779_s16   ;;  %s598_s15 = sphi %s638_s15, %s778_s15   ;;  %s594_s14 = sphi %s636_s14, %s777_s14   ;;  %s590_s13 = sphi %s634_s13, %s776_s13   ;;  %s586_s12 = sphi %s632_s12, %s775_s12  }
   0x5   : > { %s28_s20 = sadd.s32 1, %s602_s16  ;;  %s107_s21 = sadd.s32 1, %s594_s14 }
   0x6   : > { %p30_p0 = scmp.ge.s32.totalorder %s28_s20, 2  ;;  %p117_p1 = scmp.ne.s32.totalorder %s594_s14, %s590_s13 }
   0x7   : > { %p118_p2 = scmp.eq.s32.totalorder %s435_s18, 1  ;;  %p123_p3 = scmp.ne.s32.totalorder %s590_s13, %s586_s12 }
   0x8   : > { %s781_s20 = smov (%p30_p0, %s28_s20), 0  ;;  %p124_p5 = scmp.eq.s32.totalorder %s436_s19, 1 }
   0x9   : > { %p672_p4 = por %p118_p2, %p117_p1  ;;  %s102_s23 = ssub.s32 %s602_s16, %s781_s20 }
   0xa   : > { %p439_p6 = scmp.ge.s32.totalorder %s606_s17, 1  ;;  %p105_p7 = scmp.eq.s32.totalorder %s102_s23, 0 }
   0xb   : > { %p679_p8 = por %p124_p5, %p123_p3  ;;  %p161_p9 = scmp.lt.s32.totalorder %s606_s17, 3 }
   0xc   : > { %s685_s25 = scalar_select %p105_p7, %s594_s14, %s107_s21  }
   0xd   : > { %p162_p10 = pnand %p439_p6, %p161_p9 }
   0xe   : > { %p190_p11 = scmp.lt.s32.totalorder (!%p162_p10), %s598_s15, 1  ;;  %v608_v0 = vmov (!%p162_p10), 0   ;;  %v213_v1 = vld [vmem:[%s771_s2 + $0x10] sm:$0xff] (!%p162_p10)  ;;  %v211_v2 = vld [vmem:[%s771_s2] sm:$0xff] (!%p162_p10)  ;;  %v214_v3 = vld [vmem:[%s771_s2 + $0x18] sm:$0xff] (!%p162_p10)  ;;  %vm252_vm0 = vcmask (!%p162_p10), 1041408  }
   0xf   : > { %165 = sbr.rel (%p162_p10) target bundleno = 269 (0x10d), region = 32  ;;  %291 = vmatprep.mubr.bf16.mxu0 (!%p162_p10), %v608_v0  ;;  %301 = vmatprep.mubr.bf16.mxu1 (!%p162_p10), %v608_v0  ;;  %v212_v4 = vld [vmem:[%s771_s2 + $0x8] sm:$0xff] (!%p162_p10)  ;;  %v526_v10 = vld [vmem:[%s770_s1] sm:$0xff] (!%p162_p10)   ;;  %vm245_vm1 = vcmask (!%p162_p10), 31744   ;;  %s462_s30 = sshll.u32 (!%p162_p10), %s598_s15, 9 }
  0x10   : > { %524 = vset.pattern.permute.xlu1 (!%p162_p10), %v608_v0  ;;  %523 = vset.pattern.permute.xlu0 (!%p162_p10), %v608_v0  ;;  %v527_v11 = vld [vmem:[%s770_s1 + $0x8] sm:$0xff] (!%p162_p10)   ;;  %s719_s6 = scalar_lea.hbm (!%p162_p10), %s772_s3, %s462_s30  ;;  %s609_s8 = smov (!%p162_p10), [#allocation2]  }
  0x11   : > { %227 = vperm.xlu1 (!%p162_p10), %524, %v213_v1   ;;  %217 = vperm.xlu0 (!%p162_p10), %523, %v211_v2   ;;  %s532_s9 = sshll.u32 (!%p162_p10), %s609_s8, 4  ;;  %s533_s9 = int_to_ptr.vmem [resolvable:$false] %s532_s9 }
  0x12   : > { %s534_s10 = scalar_lea.vmem (!%p162_p10), %s533_s9, 1024 }
  0x15   : > { %232 = vperm.xlu1 (!%p162_p10), %524, %v214_v3   ;;  %222 = vperm.xlu0 (!%p162_p10), %523, %v212_v4  }
  0x16   : > { %s191_s26 = scalar_select %p190_p11, %s598_s15, 1 }
  0x18   : > { %s457_s4 = sshll.u32 %s191_s26, 3  ;;  %s186_s26 = sand.u32 1, %s590_s13  }
  0x19   : > { %s197_s11 = scalar_lea.vmem %s769_s0, %s457_s4  ;;  %s440_s27 = sshll.u32 %s186_s26, 5 }
  0x1a   : > { %v201_v5 = vld [vmem:[%s197_s11] sm:$0xff]  ;;  %s188_s28 = scalar_lea.vmem [#allocation2], %s440_s27  ;;  %s723_s15 = scalar_lea.sflag [#allocation3], %s186_s26 }
  0x1b   : > { %v203_v6 = vcombine.high %v201_v5, %v201_v5  ;;  %v205_v7 = vpack.c.bf16 %v201_v5, %v201_v5  ;;  %s356_s29 = sshll.u32 %s188_s28, 4  ;;  %s714_s29 = int_to_ptr.vmem [resolvable:$true] %s356_s29 }
  0x1c   : > { %s528_s7 = scalar_lea.vmem %s714_s29, 512  ;;  %p535_p1 = scmp.lt.s32.totalorder %s714_s29, %s533_s9 }
  0x1d   : > { %v206_v8 = vpack.c.bf16 %v203_v6, %v203_v6  ;;  %v254_v9 = vsel %vm252_vm0, %v205_v7, 0  ;;  %p529_p12 = scmp.ne.s32.totalorder %s714_s29, %s528_s7  ;;  %p536_p2 = scmp.lt.s32.totalorder %s534_s10, %s528_s7 }
  0x1f   : > { %445 = vmatprep.subr.msk.bf16.mxu0 %vm252_vm0, %v206_v8  ;;  %463 = vmatprep.subr.msk.bf16.mxu1 %vm252_vm0, %v206_v8  ;;  %p530_p13 = pnand %p529_p12, %p672_p4  ;;  %p537_p3 = por %p536_p2, %p535_p1 }
  0x20   : > { %260 = vmatpush1.bf16.msra.mxu0 %v254_v9  ;;  %464 = vmatpush1.bf16.msra.mxu1 %v254_v9 }
  0x21   : > { %p531_p0 = pneg %p530_p13 }
  0x23   : > { %446 = vmatmul.mubr.msk.bf16.vlgmr.msra.gmra.mrb[0].mxu0 %vm245_vm1, %v526_v10  ;;  %447 = vmatmul.mubr.msk.bf16.vlgmr.msra.gmra.mrb[0].mxu1 %vm245_vm1, %v527_v11  ;;  %p538_p5 = pnand %p537_p3, %p531_p0 }
  0x90   : > { %v228_v12 = vpop.permute.xlu1 %227  ;;  %v218_v13 = vpop.permute.xlu0 %217 }
  0x94   : > { %v233_v14 = vpop.permute.xlu1 %232  ;;  %v223_v15 = vpop.permute.xlu0 %222 }
  0xf6   : > { %v293_v16 = vpop.f32.mrb[0].mxu0  ;;  %v303_v17 = vpop.f32.mrb[0].mxu1 }
  0xf7   : > { %v294_v18 = vadd.f32 %v293_v16, %v218_v13  ;;  %v304_v19 = vadd.f32 %v303_v17, %v228_v12  ;;  %v295_v20 = vpop.f32.mrb[1].mxu0  ;;  %v305_v21 = vpop.f32.mrb[1].mxu1 }
  0xf8   : > { %v296_v22 = vadd.f32 %v295_v20, %v218_v13  ;;  %v306_v23 = vadd.f32 %v305_v21, %v228_v12  ;;  %v297_v24 = vpop.f32.mrb[2].mxu0  ;;  %v307_v25 = vpop.f32.mrb[2].mxu1 }
  0xf9   : > { %v298_v26 = vadd.f32 %v297_v24, %v223_v15  ;;  %v308_v27 = vadd.f32 %v307_v25, %v233_v14  ;;  %v299_v28 = vpop.f32.mrb[3].mxu0  ;;  %v309_v29 = vpop.f32.mrb[3].mxu1 }
  0xfa   : > { %v458_v30 = vpack.c.bf16 %v296_v22, %v294_v18  ;;  %v460_v31 = vpack.c.bf16 %v306_v23, %v304_v19  ;;  %v300_v32 = vadd.f32 %v299_v28, %v223_v15  ;;  %v310_v33 = vadd.f32 %v309_v29, %v233_v14 }
  0xfc   : > { %336 = vst [vmem:[%s188_s28] sm:$0xff] %v458_v30  ;;  %338 = vst [vmem:[%s188_s28 + $0x10] sm:$0xff] %v460_v31  ;;  %v459_v34 = vpack.c.bf16 %v300_v32, %v298_v26  ;;  %v461_v35 = vpack.c.bf16 %v310_v33, %v308_v27 }
  0xfe   : > { %337 = vst [vmem:[%s188_s28 + $0x8] sm:$0xff] %v459_v34  ;;  %339 = vst [vmem:[%s188_s28 + $0x18] sm:$0xff] %v461_v35 }
  0xff   : > { %541 = shalt.err (!%p538_p5)
}
 0x100   : > { %s542_s11 = scalar_lea.hbm %s719_s6, 512  ;;  %s546_s21 = scalar_lea.hbm %s772_s3, 1024 }
 0x101   : > { %p543_p6 = scmp.ne.s32.totalorder %s719_s6, %s542_s11  ;;  %p547_p10 = scmp.lt.u32.totalorder %s719_s6, %s772_s3 }
 0x102   : > { %p548_p11 = scmp.lt.u32.totalorder %s546_s21, %s542_s11  ;;  %p550_p13 = scmp.lt.u32.totalorder %s542_s11, %s719_s6 }
 0x103   : > { %p544_p7 = pnand %p543_p6, %p672_p4 }
 0x104   : > { %p549_p12 = por %p548_p11, %p547_p10 }
 0x105   : > { %p545_p9 = pneg %p544_p7 }
 0x106   : > { %p551_p0 = por %p550_p13, %p549_p12 }
 0x108   : > { %p552_p1 = pnand %p551_p0, %p545_p9 }
 0x10a   : > { %555 = shalt.err (!%p552_p1)
}
 0x10b   : > { %s610_s27 = smov 128   ;;  %s611_s28 = smov 8  }
 0x10c   : > { %465 = dma.vmem_to_hbm [thread:$0]  (%p672_p4), %s714_s29, 512, %s719_s6, %s723_s15, %s610_s27, %s610_s27, %s611_s28  }
 0x10d PF: > { %p471_p2 = scmp.ge.s32.totalorder %s606_s17, 2  ;;  %s371_s30 = sand.u32 1, %s586_s12  }
 0x10e   : > { %s372_s4 = scalar_lea.sflag [#allocation3], %s371_s30 }
 0x10f   : > { %p468_p3 = pnand %p471_p2, %p679_p8 }
 0x111   : > { %581 = dma.done.wait (!%p468_p3), %s372_s4, 512  }
 0x112   : > { %583 = vsyncadd (!%p468_p3), %s372_s4, 4294966784  ;;  %s16_s17 = sadd.s32 1, %s606_s17   ;;  %s775_s12 = smov %s590_s13 }
 0x113   : > { %p13_p5 = scmp.ge.s32.totalorder %s16_s17, 4   ;;  %s776_s13 = smov %s594_s14 }
 0x114   : > { %s777_s14 = smov %s685_s25  ;;  %s778_s15 = smov %s602_s16 }
 0x115   : > { %s779_s16 = smov %s781_s20  ;;  %15 = sbr.rel (!%p13_p5) target bundleno = 4 (0x4), region = 67 }
 0x11c   :  { %377 = vsyncpa [#allocation3], 1 }
 0x11d   :  { %379 = vsyncpa [#allocation3 + $0x1], 1 }

</bundles_post_ra>
